<compile_context>
chip_gen: v6e
topology: v6e:2x2x1
jax: 0.10.0
libtpu: 0.0.40
codegen_flags: <defaults>
</compile_context>

<pallas_src>
import math
import jax
import jax.numpy as jnp
from jax.experimental import pallas as pl
from jax.experimental.pallas import tpu as pltpu

# ---------------- problem sizes (small, consistent with the module) ---------
B = 2            # batch
LQ = 8           # query sequence length (Pos_embd)
LK = 8           # key/value sequence length (Traffic_embd)
E = 32           # hidden_size (embed_dim)
H = 4            # num_att_heads
DH = E // H      # head dim
DFF = 2 * E      # FFN inner dim
BLQ = B * LQ     # batch-flattened query length
BLK = B * LK     # batch-flattened key length
HBLK = H * BLK   # head-tiled key axis (block-diagonal attention width)
EP = E + 8       # input width after ones-column augmentation (8-aligned)
SROWS = 24       # rows of the packed "smalls" operand (BLQ + 5 vectors, padded)

assert DFF == HBLK, "packing below assumes FFN inner dim == H*BLK (2E == 4*B*LK)"


def mixed_attention_kernel(pos_ref, traf_ref, wqkv_ref, wow1_ref, hmw2_ref,
                           smalls_ref, out_ref):
    pos_aug = pos_ref[...]       # (BLQ, EP)   [pos | 1 | 0...]
    traf_aug = traf_ref[...]     # (BLK, EP)   [traf | 1 | 0...]
    wqkv = wqkv_ref[...]         # (EP, 3E)    [Wq|Wk|Wv] with bias row folded in
    wow1 = wow1_ref[...]         # (E, E+DFF)  [Wo | W1]
    hmw2 = hmw2_ref[...]         # (HBLK, 2E)  [head_mask | W2]
    smalls = smalls_ref[...]     # (SROWS, DFF): rows 0..BLQ-1 = attention bias,
                                 #   BLQ=bo, BLQ+1=b1, BLQ+2=b2, BLQ+3=rz, BLQ+4=rz2

    scale = 1.0 / math.sqrt(DH)  # Python literal (no captured jnp constants)

    # --- QKV projections (biases already folded via the ones column) ---------
    q = jnp.dot(pos_aug, wqkv[:, :E], preferred_element_type=jnp.float32)        # (BLQ, E)
    k = jnp.dot(traf_aug, wqkv[:, E:2 * E], preferred_element_type=jnp.float32)  # (BLK, E)
    v = jnp.dot(traf_aug, wqkv[:, 2 * E:], preferred_element_type=jnp.float32)   # (BLK, E)

    # --- block-diagonal (head-fused) attention --------------------------------
    hmask = hmw2[:, :E]                                   # (HBLK, E) 0/1 head mask
    k_bd = jnp.concatenate([k] * H, axis=0) * hmask       # (HBLK, E)
    v_bd = jnp.concatenate([v] * H, axis=0) * hmask       # (HBLK, E)

    # one scores matmul over all heads: column h*BLK + j  <->  head h, key j
    s = jax.lax.dot_general(q, k_bd, (((1,), (1,)), ((), ())),
                            preferred_element_type=jnp.float32)        # (BLQ, HBLK)
    s = s * scale + smalls[0:BLQ, :]                       # additive mask bias (f32)

    # single global row-max is a valid stabilizer for every head block
    m = jnp.max(s, axis=-1, keepdims=True)
    p = jnp.exp(s - m)                                     # masked entries -> 0

    # per-head denominators broadcast to each head's lanes, via one MXU op
    denom = jnp.dot(p, hmask, preferred_element_type=jnp.float32)      # (BLQ, E)
    o = jnp.dot(p, v_bd, preferred_element_type=jnp.float32) \
        * pl.reciprocal(denom, approx=True)                            # (BLQ, E)

    attn = jnp.dot(o, wow1[:, :E], preferred_element_type=jnp.float32) \
        + smalls[BLQ:BLQ + 1, :E]                          # + bo
    mixed = smalls[BLQ + 3:BLQ + 4, :E] * attn + pos_aug[:, :E]        # ReZero 1

    # --- FeedForwardNetwork ----------------------------------------------------
    hdn = jnp.dot(mixed, wow1[:, E:], preferred_element_type=jnp.float32) \
        + smalls[BLQ + 1:BLQ + 2, :]                       # + b1  -> (BLQ, DFF)
    hdn = jnp.maximum(hdn, 0.0)
    ff = jnp.dot(hdn, hmw2[:, E:], preferred_element_type=jnp.float32) \
        + smalls[BLQ + 2:BLQ + 3, :E]                      # + b2  -> (BLQ, E)

    # --- ReZero residual 2 (dropout is identity at inference) ------------------
    out_ref[...] = mixed + smalls[BLQ + 4:BLQ + 5, :E] * ff


def mixed_attention_layer(pos, traf, mask_bool, params):
    """pos: (B, LQ, E), traf: (B, LK, E), mask_bool: (B, LK) True = padded key."""
    (wq, wk, wv, bq, bk, bv, wo, bo, w1, b1, w2, b2, rz, rz2) = params
    f32 = jnp.float32

    pos2d = pos.reshape(BLQ, E).astype(f32)
    traf2d = traf.reshape(BLK, E).astype(f32)

    # ---- fold QKV biases into the weights via a ones column -------------------
    def aug(x):
        n = x.shape[0]
        return jnp.concatenate(
            [x, jnp.ones((n, 1), f32), jnp.zeros((n, EP - E - 1), f32)], axis=1)

    pos_aug = aug(pos2d)      # (BLQ, EP)
    traf_aug = aug(traf2d)    # (BLK, EP)

    wqkv = jnp.concatenate([wq, wk, wv], axis=1)                       # (E, 3E)
    bqkv = jnp.concatenate([bq, bk, bv], axis=1)                       # (1, 3E)
    wqkv_aug = jnp.concatenate(
        [wqkv, bqkv, jnp.zeros((EP - E - 1, 3 * E), f32)], axis=0)     # (EP, 3E)

    wow1 = jnp.concatenate([wo, w1], axis=1)                           # (E, E+DFF)

    # ---- block-diagonal head mask, packed with W2 ------------------------------
    row_head = jnp.arange(HBLK) // BLK
    col_head = jnp.arange(E) // DH
    hmask = (row_head[:, None] == col_head[None, :]).astype(f32)       # (HBLK, E)
    hmw2 = jnp.concatenate([hmask, w2], axis=1)                        # (HBLK, 2E)

    # ---- additive attention bias (key padding + batch block-diagonal), head-tiled
    key_bias = jnp.where(mask_bool, -1e9, 0.0).astype(f32)             # (B, LK)
    key_bias_full = jnp.broadcast_to(key_bias.reshape(1, BLK), (BLQ, BLK))
    same_batch = (jnp.arange(BLQ) // LQ)[:, None] == (jnp.arange(BLK) // LK)[None, :]
    bias_full = jnp.where(same_batch, key_bias_full, -2e9).astype(f32)  # (BLQ, BLK)
    bias_bd = jnp.tile(bias_full, (1, H))                               # (BLQ, HBLK)

    # ---- pack bias + all small vectors into one lane-dense operand -------------
    def pad_row(x):
        return jnp.concatenate([x, jnp.zeros((1, DFF - x.shape[1]), f32)], axis=1)

    smalls = jnp.concatenate(
        [bias_bd, pad_row(bo), pad_row(b1), pad_row(b2), pad_row(rz), pad_row(rz2),
         jnp.zeros((SROWS - BLQ - 5, DFF), f32)], axis=0)               # (SROWS, DFF)

    operands = (pos_aug, traf_aug, wqkv_aug, wow1, hmw2, smalls)

    out2d = pl.pallas_call(
        mixed_attention_kernel,
        out_shape=jax.ShapeDtypeStruct((BLQ, E), jnp.float32),
        # No grid: single invocation, whole working set (~40 KiB) resident in VMEM,
        # no pipeline prologue/epilogue and no double-buffering.
        in_specs=[pl.BlockSpec(memory_space=pltpu.MemorySpace.VMEM)] * len(operands),
        out_specs=pl.BlockSpec(memory_space=pltpu.MemorySpace.VMEM),
    )(*operands)

    return out2d.reshape(B, LQ, E)


# ------------------------ pure-JAX reference (for checking) -----------------
def reference(pos, traf, mask_bool, params):
    (wq, wk, wv, bq, bk, bv, wo, bo, w1, b1, w2, b2, rz, rz2) = params
    q = pos @ wq + bq[0]
    k = traf @ wk + bk[0]
    v = traf @ wv + bv[0]
    qh = q.reshape(B, LQ, H, DH).transpose(0, 2, 1, 3)
    kh = k.reshape(B, LK, H, DH).transpose(0, 2, 1, 3)
    vh = v.reshape(B, LK, H, DH).transpose(0, 2, 1, 3)
    scores = jnp.einsum("bhqd,bhkd->bhqk", qh, kh) / math.sqrt(DH)
    scores = jnp.where(mask_bool[:, None, None, :], -1e9, scores)
    p = jax.nn.softmax(scores, axis=-1)
    o = jnp.einsum("bhqk,bhkd->bhqd", p, vh).transpose(0, 2, 1, 3).reshape(B, LQ, E)
    attn = o @ wo + bo[0]
    mixed = rz[0] * attn + pos
    ff = jnp.maximum(mixed @ w1 + b1[0], 0.0) @ w2 + b2[0]
    return mixed + rz2[0] * ff


if __name__ == "__main__":
    key = jax.random.PRNGKey(0)
    keys = jax.random.split(key, 20)

    # Activations
    pos = jax.random.normal(keys[0], (B, LQ, E), jnp.float32)
    traf = jax.random.normal(keys[1], (B, LK, E), jnp.float32)
    # Scene_mask: True = padded key (ignore).  Keep at least one key unmasked.
    mask_bool = jax.random.bernoulli(keys[2], 0.3, (B, LK))
    mask_bool = mask_bool.at[:, 0].set(False)

    # Parameters (deterministic; weight matrices stored [in, out], i.e. already
    # transposed relative to PyTorch's nn.Linear convention).
    s = 0.1
    wq = s * jax.random.normal(keys[3], (E, E), jnp.float32)
    wk = s * jax.random.normal(keys[4], (E, E), jnp.float32)
    wv = s * jax.random.normal(keys[5], (E, E), jnp.float32)
    bq = s * jax.random.normal(keys[6], (1, E), jnp.float32)
    bk = s * jax.random.normal(keys[7], (1, E), jnp.float32)
    bv = s * jax.random.normal(keys[8], (1, E), jnp.float32)
    wo = s * jax.random.normal(keys[9], (E, E), jnp.float32)
    bo = s * jax.random.normal(keys[10], (1, E), jnp.float32)
    w1 = s * jax.random.normal(keys[11], (E, DFF), jnp.float32)
    b1 = s * jax.random.normal(keys[12], (1, DFF), jnp.float32)
    w2 = s * jax.random.normal(keys[13], (DFF, E), jnp.float32)
    b2 = s * jax.random.normal(keys[14], (1, E), jnp.float32)
    # Module initializes Rezero params to zeros; use nonzero deterministic values
    # so the attention/FFN paths are actually exercised by the parity check.
    rz = 0.2 * jnp.ones((1, E), jnp.float32)
    rz2 = 0.2 * jnp.ones((1, E), jnp.float32)

    params = (wq, wk, wv, bq, bk, bv, wo, bo, w1, b1, w2, b2, rz, rz2)

    out = mixed_attention_layer(pos, traf, mask_bool, params)
    out = jax.block_until_ready(out)

    ref = reference(pos, traf, mask_bool, params)
    assert out.shape == (B, LQ, E)
    # Default (non-'highest') MXU matmul precision + approx reciprocal => ~1e-3
    # level numerical differences; 1e-2 tolerance still catches structural errors.
    assert jnp.allclose(out, ref, atol=1e-2, rtol=1e-2), "mismatch vs reference"

    print("KERNEL_OK")
</pallas_src>

<mosaic_0001>
module attributes {stable_mosaic.version = 11 : i64} {
  func.func @mixed_attention_kernel(%arg0: memref<16x40xf32, #tpu.memory_space<vmem>>, %arg1: memref<16x40xf32, #tpu.memory_space<vmem>>, %arg2: memref<40x96xf32, #tpu.memory_space<vmem>>, %arg3: memref<32x96xf32, #tpu.memory_space<vmem>>, %arg4: memref<64x64xf32, #tpu.memory_space<vmem>>, %arg5: memref<24x64xf32, #tpu.memory_space<vmem>>, %arg6: memref<16x32xf32, #tpu.memory_space<vmem>>) attributes {dimension_semantics = [], scalar_prefetch = 0 : i64, scratch_operands = 0 : i64, tpu.core_type = #tpu.core_type<tc>} {
    %c0 = arith.constant 0 : index
    %c0_0 = arith.constant 0 : index
    %0 = vector.load %arg0[%c0, %c0_0] : memref<16x40xf32, #tpu.memory_space<vmem>>, vector<16x40xf32>
    %c0_1 = arith.constant 0 : index
    %c0_2 = arith.constant 0 : index
    %1 = vector.load %arg1[%c0_1, %c0_2] : memref<16x40xf32, #tpu.memory_space<vmem>>, vector<16x40xf32>
    %c0_3 = arith.constant 0 : index
    %c0_4 = arith.constant 0 : index
    %2 = vector.load %arg2[%c0_3, %c0_4] : memref<40x96xf32, #tpu.memory_space<vmem>>, vector<40x96xf32>
    %c0_5 = arith.constant 0 : index
    %c0_6 = arith.constant 0 : index
    %3 = vector.load %arg3[%c0_5, %c0_6] : memref<32x96xf32, #tpu.memory_space<vmem>>, vector<32x96xf32>
    %c0_7 = arith.constant 0 : index
    %c0_8 = arith.constant 0 : index
    %4 = vector.load %arg4[%c0_7, %c0_8] : memref<64x64xf32, #tpu.memory_space<vmem>>, vector<64x64xf32>
    %c0_9 = arith.constant 0 : index
    %c0_10 = arith.constant 0 : index
    %5 = vector.load %arg5[%c0_9, %c0_10] : memref<24x64xf32, #tpu.memory_space<vmem>>, vector<24x64xf32>
    %6 = vector.extract_strided_slice %2 {offsets = [0, 0], sizes = [40, 32], strides = [1, 1]} : vector<40x96xf32> to vector<40x32xf32>
    %cst = arith.constant dense<0.000000e+00> : vector<16x32xf32>
    %7 = tpu.matmul %0, %6, %cst {dimension_numbers = #tpu.dot_dimension_numbers<[1], [0], [0], [1], [0, 0, 1, 1], [], []>} : vector<16x40xf32>, vector<40x32xf32>, vector<16x32xf32> -> vector<16x32xf32>
    %8 = vector.extract_strided_slice %2 {offsets = [0, 32], sizes = [40, 32], strides = [1, 1]} : vector<40x96xf32> to vector<40x32xf32>
    %cst_11 = arith.constant dense<0.000000e+00> : vector<16x32xf32>
    %9 = tpu.matmul %1, %8, %cst_11 {dimension_numbers = #tpu.dot_dimension_numbers<[1], [0], [0], [1], [0, 0, 1, 1], [], []>} : vector<16x40xf32>, vector<40x32xf32>, vector<16x32xf32> -> vector<16x32xf32>
    %10 = vector.extract_strided_slice %2 {offsets = [0, 64], sizes = [40, 32], strides = [1, 1]} : vector<40x96xf32> to vector<40x32xf32>
    %cst_12 = arith.constant dense<0.000000e+00> : vector<16x32xf32>
    %11 = tpu.matmul %1, %10, %cst_12 {dimension_numbers = #tpu.dot_dimension_numbers<[1], [0], [0], [1], [0, 0, 1, 1], [], []>} : vector<16x40xf32>, vector<40x32xf32>, vector<16x32xf32> -> vector<16x32xf32>
    %12 = vector.extract_strided_slice %4 {offsets = [0, 0], sizes = [64, 32], strides = [1, 1]} : vector<64x64xf32> to vector<64x32xf32>
    %13 = tpu.concatenate %9, %9, %9, %9 in 0 : vector<16x32xf32>, vector<16x32xf32>, vector<16x32xf32>, vector<16x32xf32> -> vector<64x32xf32>
    %14 = arith.mulf %13, %12 : vector<64x32xf32>
    %15 = tpu.concatenate %11, %11, %11, %11 in 0 : vector<16x32xf32>, vector<16x32xf32>, vector<16x32xf32>, vector<16x32xf32> -> vector<64x32xf32>
    %16 = arith.mulf %15, %12 : vector<64x32xf32>
    %cst_13 = arith.constant dense<0.000000e+00> : vector<16x64xf32>
    %17 = tpu.matmul %7, %14, %cst_13 {dimension_numbers = #tpu.dot_dimension_numbers<[1], [1], [0], [0], [0, 0, 1, 0], [], []>} : vector<16x32xf32>, vector<64x32xf32>, vector<16x64xf32> -> vector<16x64xf32>
    %cst_14 = arith.constant 0.353553385 : f32
    %18 = vector.broadcast %cst_14 : f32 to vector<16x64xf32>
    %19 = arith.mulf %17, %18 : vector<16x64xf32>
    %20 = vector.extract_strided_slice %5 {offsets = [0, 0], sizes = [16, 64], strides = [1, 1]} : vector<24x64xf32> to vector<16x64xf32>
    %21 = arith.addf %19, %20 : vector<16x64xf32>
    %cst_15 = arith.constant dense<0xFF800000> : vector<16xf32>
    %22 = vector.multi_reduction <maximumf>, %21, %cst_15 [1] : vector<16x64xf32> to vector<16xf32>
    %23 = vector.shape_cast %22 : vector<16xf32> to vector<16x1xf32>
    %24 = vector.broadcast %23 : vector<16x1xf32> to vector<16x64xf32>
    %25 = arith.subf %21, %24 : vector<16x64xf32>
    %26 = math.exp %25 : vector<16x64xf32>
    %cst_16 = arith.constant dense<0.000000e+00> : vector<16x32xf32>
    %27 = tpu.matmul %26, %12, %cst_16 {dimension_numbers = #tpu.dot_dimension_numbers<[1], [0], [0], [1], [0, 0, 1, 1], [], []>} : vector<16x64xf32>, vector<64x32xf32>, vector<16x32xf32> -> vector<16x32xf32>
    %cst_17 = arith.constant dense<0.000000e+00> : vector<16x32xf32>
    %28 = tpu.matmul %26, %16, %cst_17 {dimension_numbers = #tpu.dot_dimension_numbers<[1], [0], [0], [1], [0, 0, 1, 1], [], []>} : vector<16x64xf32>, vector<64x32xf32>, vector<16x32xf32> -> vector<16x32xf32>
    %29 = tpu.reciprocal %27 {approx = true} : vector<16x32xf32> -> vector<16x32xf32>
    %30 = arith.mulf %28, %29 : vector<16x32xf32>
    %31 = vector.extract_strided_slice %3 {offsets = [0, 0], sizes = [32, 32], strides = [1, 1]} : vector<32x96xf32> to vector<32x32xf32>
    %cst_18 = arith.constant dense<0.000000e+00> : vector<16x32xf32>
    %32 = tpu.matmul %30, %31, %cst_18 {dimension_numbers = #tpu.dot_dimension_numbers<[1], [0], [0], [1], [0, 0, 1, 1], [], []>} : vector<16x32xf32>, vector<32x32xf32>, vector<16x32xf32> -> vector<16x32xf32>
    %33 = vector.extract_strided_slice %5 {offsets = [16, 0], sizes = [1, 32], strides = [1, 1]} : vector<24x64xf32> to vector<1x32xf32>
    %34 = vector.broadcast %33 : vector<1x32xf32> to vector<16x32xf32>
    %35 = arith.addf %32, %34 : vector<16x32xf32>
    %36 = vector.extract_strided_slice %5 {offsets = [19, 0], sizes = [1, 32], strides = [1, 1]} : vector<24x64xf32> to vector<1x32xf32>
    %37 = vector.broadcast %36 : vector<1x32xf32> to vector<16x32xf32>
    %38 = arith.mulf %37, %35 : vector<16x32xf32>
    %39 = vector.extract_strided_slice %0 {offsets = [0, 0], sizes = [16, 32], strides = [1, 1]} : vector<16x40xf32> to vector<16x32xf32>
    %40 = arith.addf %38, %39 : vector<16x32xf32>
    %41 = vector.extract_strided_slice %3 {offsets = [0, 32], sizes = [32, 64], strides = [1, 1]} : vector<32x96xf32> to vector<32x64xf32>
    %cst_19 = arith.constant dense<0.000000e+00> : vector<16x64xf32>
    %42 = tpu.matmul %40, %41, %cst_19 {dimension_numbers = #tpu.dot_dimension_numbers<[1], [0], [0], [1], [0, 0, 1, 1], [], []>} : vector<16x32xf32>, vector<32x64xf32>, vector<16x64xf32> -> vector<16x64xf32>
    %43 = vector.extract_strided_slice %5 {offsets = [17, 0], sizes = [1, 64], strides = [1, 1]} : vector<24x64xf32> to vector<1x64xf32>
    %44 = vector.broadcast %43 : vector<1x64xf32> to vector<16x64xf32>
    %45 = arith.addf %42, %44 : vector<16x64xf32>
    %cst_20 = arith.constant 0.000000e+00 : f32
    %46 = vector.broadcast %cst_20 : f32 to vector<16x64xf32>
    %47 = arith.maximumf %45, %46 : vector<16x64xf32>
    %48 = vector.extract_strided_slice %4 {offsets = [0, 32], sizes = [64, 32], strides = [1, 1]} : vector<64x64xf32> to vector<64x32xf32>
    %cst_21 = arith.constant dense<0.000000e+00> : vector<16x32xf32>
    %49 = tpu.matmul %47, %48, %cst_21 {dimension_numbers = #tpu.dot_dimension_numbers<[1], [0], [0], [1], [0, 0, 1, 1], [], []>} : vector<16x64xf32>, vector<64x32xf32>, vector<16x32xf32> -> vector<16x32xf32>
    %50 = vector.extract_strided_slice %5 {offsets = [18, 0], sizes = [1, 32], strides = [1, 1]} : vector<24x64xf32> to vector<1x32xf32>
    %51 = vector.broadcast %50 : vector<1x32xf32> to vector<16x32xf32>
    %52 = arith.addf %49, %51 : vector<16x32xf32>
    %53 = vector.extract_strided_slice %5 {offsets = [20, 0], sizes = [1, 32], strides = [1, 1]} : vector<24x64xf32> to vector<1x32xf32>
    %54 = vector.broadcast %53 : vector<1x32xf32> to vector<16x32xf32>
    %55 = arith.mulf %54, %52 : vector<16x32xf32>
    %56 = arith.addf %40, %55 : vector<16x32xf32>
    %c0_22 = arith.constant 0 : index
    %c0_23 = arith.constant 0 : index
    %57 = vector.load %arg6[%c0_22, %c0_23] : memref<16x32xf32, #tpu.memory_space<vmem>>, vector<16x32xf32>
    tpu.vector_store %arg6[%c0_22, %c0_23], %56 {strides = array<i32>} : memref<16x32xf32, #tpu.memory_space<vmem>>, vector<16x32xf32>,
    return
  }
}

</mosaic_0001>

<bundles_post_ra>
// kernel: tpu_custom_call.1
= control target key start
LH: loop header
LB: loop body
LE: loop exit
PB: predicated region body
PF: predicated region fallthrough
CT: control target
= control target key end

     0   :  { %11 = vsyncpa [#allocation3], 0  ;;  %s1661_s0 = inlined_call_operand.hbm [shape: f32[16,40], index: 0, kind: input, shape index: {}]   ;;  %s1662_s1 = inlined_call_operand.hbm [shape: f32[16,40], index: 1, kind: input, shape index: {}]   ;;  %s1663_s2 = inlined_call_operand.hbm [shape: f32[40,96], index: 2, kind: input, shape index: {}]   ;;  %s1664_s3 = inlined_call_operand.hbm [shape: f32[32,96], index: 3, kind: input, shape index: {}]   ;;  %s1665_s4 = inlined_call_operand.hbm [shape: f32[64,64], index: 4, kind: input, shape index: {}]   ;;  %s1666_s5 = inlined_call_operand.hbm [shape: f32[24,64], index: 5, kind: input, shape index: {}]   ;;  %s1667_s6 = inlined_call_operand.hbm [shape: f32[16,32], index: 6, kind: output, shape index: {}]  }
   0x1   :  { %12 = vsyncpa [#allocation6], 0 }
   0x2   :  { %13 = vsyncpa [#allocation9], 0 }
   0x3   :  { %14 = vsyncpa [#allocation12], 0 }
   0x4   :  { %15 = vsyncpa [#allocation4], 0  ;;  %s1450_s21 = smov [#allocation5]   ;;  %s1451_s23 = smov [#allocation8]  }
   0x5   :  { %s33_s22 = sshll.u32 %s1450_s21, 4  ;;  %s57_s24 = sshll.u32 %s1451_s23, 4  ;;  %s34_s22 = int_to_ptr.vmem [resolvable:$true] %s33_s22  ;;  %s58_s24 = int_to_ptr.vmem [resolvable:$true] %s57_s24 }
   0x6   :  { %s1308_s25 = scalar_lea.vmem %s34_s22, 256  ;;  %p1313_p1 = scmp.lt.s32.totalorder %s34_s22, %s34_s22 }
   0x7   :  { %p1309_p0 = scmp.ne.s32.totalorder %s34_s22, %s1308_s25  ;;  %p1314_p2 = scmp.lt.s32.totalorder %s1308_s25, %s1308_s25 }
   0x9   :  { %p1315_p3 = por %p1314_p2, %p1313_p1 }
   0xb   :  { %p1316_p4 = pnand %p1315_p3, %p1309_p0 }
   0xd   :  { %1319 = shalt.err (!%p1316_p4)
}
   0xe   :  { %s1452_s26 = smov 128   ;;  %s1453_s27 = smov 8  }
   0xf   :  { %39 = dma.hbm_to_vmem [thread:$0]  %s1662_s1, 256, %s34_s22, [#allocation6], %s1452_s26, %s1452_s26, %s1453_s27  }
  0x10   :  { %s1328_s30 = scalar_lea.vmem %s58_s24, 512  ;;  %p1333_p6 = scmp.lt.s32.totalorder %s58_s24, %s58_s24 }
  0x11   :  { %p1329_p5 = scmp.ne.s32.totalorder %s58_s24, %s1328_s30  ;;  %p1334_p7 = scmp.lt.s32.totalorder %s1328_s30, %s1328_s30 }
  0x13   :  { %p1335_p8 = por %p1334_p7, %p1333_p6 }
  0x15   :  { %p1336_p9 = pnand %p1335_p8, %p1329_p5 }
  0x17   :  { %1339 = shalt.err (!%p1336_p9)
}
  0x18   :  { %63 = dma.hbm_to_vmem [thread:$0]  %s1664_s3, 512, %s58_s24, [#allocation9], %s1452_s26, %s1452_s26, %s1453_s27  }
  0x19   :  { %s1454_s9 = smov [#allocation2]   ;;  %s1455_s11 = smov [#allocation7]  }
  0x1a   :  { %s21_s10 = sshll.u32 %s1454_s9, 4  ;;  %s45_s12 = sshll.u32 %s1455_s11, 4  ;;  %s22_s10 = int_to_ptr.vmem [resolvable:$true] %s21_s10  ;;  %s46_s12 = int_to_ptr.vmem [resolvable:$true] %s45_s12 }
  0x1b   :  { %s1348_s1 = scalar_lea.vmem %s22_s10, 256  ;;  %p1353_p11 = scmp.lt.s32.totalorder %s22_s10, %s22_s10 }
  0x1c   :  { %p1349_p10 = scmp.ne.s32.totalorder %s22_s10, %s1348_s1  ;;  %p1354_p12 = scmp.lt.s32.totalorder %s1348_s1, %s1348_s1 }
  0x1e   :  { %p1355_p13 = por %p1354_p12, %p1353_p11 }
  0x20   :  { %p1356_p0 = pnand %p1355_p13, %p1349_p10 }
  0x22   :  { %1359 = shalt.err (!%p1356_p0)
}
  0x23   :  { %27 = dma.hbm_to_vmem [thread:$0]  %s1661_s0, 256, %s22_s10, [#allocation3], %s1452_s26, %s1452_s26, %s1453_s27  }
  0x24   :  { %s1368_s3 = scalar_lea.vmem %s46_s12, 640  ;;  %p1373_p2 = scmp.lt.s32.totalorder %s46_s12, %s46_s12 }
  0x25   :  { %p1369_p1 = scmp.ne.s32.totalorder %s46_s12, %s1368_s3  ;;  %p1374_p3 = scmp.lt.s32.totalorder %s1368_s3, %s1368_s3 }
  0x27   :  { %p1375_p4 = por %p1374_p3, %p1373_p2 }
  0x29   :  { %p1376_p5 = pnand %p1375_p4, %p1369_p1 }
  0x2b   :  { %1379 = shalt.err (!%p1376_p5)
}
  0x2c   :  { %51 = dma.hbm_to_vmem [thread:$0]  %s1663_s2, 640, %s46_s12, [#allocation6], %s1452_s26, %s1452_s26, %s1453_s27  }
  0x2d   :  { %s1456_s17 = smov [#allocation10]   ;;  %s1457_s19 = smov [#allocation11]  }
  0x2e   :  { %s69_s18 = sshll.u32 %s1456_s17, 4  ;;  %s81_s20 = sshll.u32 %s1457_s19, 4  ;;  %s70_s18 = int_to_ptr.vmem [resolvable:$true] %s69_s18  ;;  %s82_s20 = int_to_ptr.vmem [resolvable:$true] %s81_s20 }
  0x2f   :  { %s1388_s0 = scalar_lea.vmem %s70_s18, 1024  ;;  %p1393_p7 = scmp.lt.s32.totalorder %s70_s18, %s70_s18 }
  0x30   :  { %p1389_p6 = scmp.ne.s32.totalorder %s70_s18, %s1388_s0  ;;  %p1394_p8 = scmp.lt.s32.totalorder %s1388_s0, %s1388_s0 }
  0x32   :  { %p1395_p9 = por %p1394_p8, %p1393_p7 }
  0x34   :  { %p1396_p10 = pnand %p1395_p9, %p1389_p6 }
  0x36   :  { %1399 = shalt.err (!%p1396_p10)
}
  0x37   :  { %75 = dma.hbm_to_vmem [thread:$0]  %s1665_s4, 1024, %s70_s18, [#allocation9], %s1452_s26, %s1452_s26, %s1453_s27  }
  0x38   :  { %s1408_s2 = scalar_lea.vmem %s82_s20, 384  ;;  %p1413_p12 = scmp.lt.s32.totalorder %s82_s20, %s82_s20 }
  0x39   :  { %p1409_p11 = scmp.ne.s32.totalorder %s82_s20, %s1408_s2  ;;  %p1414_p13 = scmp.lt.s32.totalorder %s1408_s2, %s1408_s2 }
  0x3b   :  { %p1415_p0 = por %p1414_p13, %p1413_p12 }
  0x3d   :  { %p1416_p1 = pnand %p1415_p0, %p1409_p11 }
  0x3f   :  { %1419 = shalt.err (!%p1416_p1)
}
  0x40   :  { %87 = dma.hbm_to_vmem [thread:$0]  %s1666_s5, 384, %s82_s20, [#allocation12], %s1452_s26, %s1452_s26, %s1453_s27  }
  0x41   :  { %1440 = dma.done.wait [#allocation3], 256  }
  0x42   :  { %1441 = vsyncadd [#allocation3], 4294967040 }
  0x43   :  { %1442 = dma.done.wait [#allocation6], 896  }
  0x44   :  { %1443 = vsyncadd [#allocation6], 4294966400 }
  0x45   :  { %1444 = dma.done.wait [#allocation9], 1536  }
  0x46   :  { %1445 = vsyncadd [#allocation9], 4294965760 }
  0x47   :  { %1446 = dma.done.wait [#allocation12], 384  }
  0x48   :  { %1447 = vsyncadd [#allocation12], 4294966912  ;;  %vm130_vm0 = vcmask 326656   ;;  %v114_v0 = vld [vmem:[#allocation7 + $0x20] sm:$0xff]  ;;  %v112_v1 = vld [vmem:[#allocation7 + $0x10] sm:$0xff]  ;;  %s1458_s4 = smov 96  }
  0x49   :  { %225 = vrot.lane.b32.xlu0 %v114_v0, %s1458_s4  ;;  %221 = vrot.lane.b32.xlu1 %v112_v1, %s1458_s4  ;;  %v108_v2 = vld [vmem:[#allocation5] sm:$0xff]  ;;  %v113_v3 = vld [vmem:[#allocation7 + $0x18] sm:$0xff]  ;;  %v111_v4 = vld [vmem:[#allocation7 + $0x8] sm:$0xff]  ;;  %vm419_vm1 = vcmask 261120   ;;  %s1459_s5 = smov 64   ;;  %vm529_vm2 = vcmask 523264  }
  0x4a   :  { %1167 = vmatprep.mubr.msk.f32.mxu1 %vm130_vm0, %v108_v2  ;;  %1144 = vmatprep.subr.mxu0 %v114_v0  ;;  %v1535_v5 = vld [vmem:[#allocation2] sm:$0xff]  ;;  %v1542_v7 = vld [vmem:[#allocation2 + $0x8] sm:$0xff]  ;;  %v1547_v13 = vld [vmem:[#allocation5 + $0x8] sm:$0xff]  ;;  %s1460_s25 = smov [#allocation13]  }
  0x4b   :  { %1145 = vmatpush3.msra.mxu0 %v114_v0  ;;  %1154 = vmatprep.mubr.msk.f32.mxu0 %vm130_vm0, %v1535_v5  ;;  %v110_v6 = vld [vmem:[#allocation7] sm:$0xff]  ;;  %v1554_v18 = vld [vmem:[#allocation10 + $0x30] sm:$0xff]  ;;  %v1559_v22 = vld [vmem:[#allocation10 + $0x28] sm:$0xff]  ;;  %s1030_s28 = sshll.u32 %s1460_s25, 4  ;;  %s1031_s28 = int_to_ptr.vmem [resolvable:$true] %s1030_s28 }
  0x4c   :  { %1146 = vmatprep.subr.mxu0 %v113_v3  ;;  %v1552_v16 = vld [vmem:[#allocation10 + $0x38] sm:$0xff]  ;;  %v1564_v24 = vld [vmem:[#allocation10 + $0x20] sm:$0xff]  ;;  %v1574_v28 = vld [vmem:[#allocation10 + $0x10] sm:$0xff]  ;;  %s1420_s29 = scalar_lea.vmem %s1031_s28, 256  ;;  %p1425_p3 = scmp.lt.s32.totalorder %s1031_s28, %s1031_s28 }
  0x4d   :  { %223 = vrot.lane.b32.xlu0 %v113_v3, %s1458_s4  ;;  %219 = vrot.lane.b32.xlu1 %v111_v4, %s1458_s4  ;;  %v1569_v26 = vld [vmem:[#allocation10 + $0x18] sm:$0xff]  ;;  %v1579_v30 = vld [vmem:[#allocation10 + $0x8] sm:$0xff]  ;;  %v1584_v34 = vld [vmem:[#allocation10] sm:$0xff]  ;;  %p1421_p2 = scmp.ne.s32.totalorder %s1031_s28, %s1420_s29  ;;  %p1426_p4 = scmp.lt.s32.totalorder %s1420_s29, %s1420_s29 }
  0x4e   :  { %1147 = vmatpush3.msra.mxu0 %v113_v3  ;;  %v128_v40 = vld [vmem:[#allocation11 + $0x8] sm:$0xff]  ;;  %v127_v43 = vld [vmem:[#allocation11] sm:$0xff] }
  0x4f   :  { %1148 = vmatprep.subr.mxu0 %v112_v1  ;;  %p1427_p5 = por %p1426_p4, %p1425_p3 }
  0x50   :  { %1149 = vmatpush3.msra.mxu0 %v112_v1 }
  0x51   :  { %217 = vrot.lane.b32.xlu0 %v110_v6, %s1458_s4  ;;  %1150 = vmatprep.subr.mxu0 %v111_v4  ;;  %p1428_p6 = pnand %p1427_p5, %p1421_p2 }
  0x52   :  { %1151 = vmatpush3.msra.mxu0 %v111_v4  ;;  %321 = vrot.lane.b32.xlu1 %v114_v0, %s1459_s5 }
  0x53   :  { %1152 = vmatprep.subr.mxu0 %v110_v6 }
  0x54   :  { %1153 = vmatpush3.msra.mxu0 %v110_v6 }
  0x55   :  { %1155 = vmatmul.mubr.msk.f32.vlgmr.msra.gmra.mxu0 %vm130_vm0, %v1542_v7  ;;  %319 = vrot.lane.b32.xlu0 %v113_v3, %s1459_s5  ;;  %v118_v3 = vld [vmem:[#allocation8 + $0x18] sm:$0xff] }
  0x56   :  { %1180 = vmatprep.mubr.msk.f32.mxu0 %vm130_vm0, %v108_v2  ;;  %317 = vrot.lane.b32.xlu1 %v112_v1, %s1459_s5 }
  0x59   :  { %315 = vrot.lane.b32.xlu0 %v111_v4, %s1459_s5  ;;  %v117_v4 = vld [vmem:[#allocation8 + $0x10] sm:$0xff] }
  0x5a   :  { %313 = vrot.lane.b32.xlu1 %v110_v6, %s1459_s5  ;;  %v116_v6 = vld [vmem:[#allocation8 + $0x8] sm:$0xff] }
  0xbb   :  { %v226_v8 = vpop.permute.xlu0 %225  ;;  %v222_v9 = vpop.permute.xlu1 %221 }
  0xbc   :  { %1157 = vmatprep.subr.mxu1 %v226_v8 }
  0xbd   :  { %1158 = vmatpush3.msra.mxu1 %v226_v8  ;;  %v115_v8 = vld [vmem:[#allocation8] sm:$0xff] }
  0xbf   :  { %v224_v10 = vpop.permute.xlu0 %223  ;;  %v220_v11 = vpop.permute.xlu1 %219 }
  0xc0   :  { %1159 = vmatprep.subr.mxu1 %v224_v10 }
  0xc1   :  { %1160 = vmatpush3.msra.mxu1 %v224_v10 }
  0xc2   :  { %1161 = vmatprep.subr.mxu1 %v222_v9 }
  0xc3   :  { %1162 = vmatpush3.msra.mxu1 %v222_v9  ;;  %v218_v12 = vpop.permute.xlu0 %217 }
  0xc4   :  { %1163 = vmatprep.subr.mxu1 %v220_v11  ;;  %v322_v31 = vpop.permute.xlu1 %321 }
  0xc5   :  { %1164 = vmatpush3.msra.mxu1 %v220_v11  ;;  %1170 = vmatprep.subr.mxu0 %v322_v31 }
  0xc6   :  { %1165 = vmatprep.subr.mxu1 %v218_v12  ;;  %1171 = vmatpush3.msra.mxu0 %v322_v31 }
  0xc7   :  { %1166 = vmatpush3.msra.mxu1 %v218_v12  ;;  %v320_v32 = vpop.permute.xlu0 %319 }
  0xc8   :  { %1168 = vmatmul.mubr.msk.f32.vlgmr.msra.gmra.mxu1 %vm130_vm0, %v1547_v13  ;;  %1172 = vmatprep.subr.mxu0 %v320_v32  ;;  %v318_v35 = vpop.permute.xlu1 %317 }
  0xc9   :  { %1173 = vmatpush3.msra.mxu0 %v320_v32 }
  0xca   :  { %1174 = vmatprep.subr.mxu0 %v318_v35 }
  0xcb   :  { %v316_v36 = vpop.permute.xlu0 %315  ;;  %1175 = vmatpush3.msra.mxu0 %v318_v35 }
  0xcc   :  { %1176 = vmatprep.subr.mxu0 %v316_v36  ;;  %v314_v38 = vpop.permute.xlu1 %313 }
  0xcd   :  { %1177 = vmatpush3.msra.mxu0 %v316_v36 }
  0xce   :  { %1178 = vmatprep.subr.mxu0 %v314_v38 }
  0xcf   :  { %1179 = vmatpush3.msra.mxu0 %v314_v38 }
  0xd0   :  { %1181 = vmatmul.mubr.msk.f32.vlgmr.msra.gmra.mxu0 %vm130_vm0, %v1547_v13  ;;  %1202 = vmatprep.subr.mxu0 %v1552_v16 }
  0xd1   :  { %1203 = vmatpush3.msra.mxu0 %v1552_v16 }
  0xd2   :  { %1204 = vmatprep.subr.mxu0 %v1554_v18 }
  0xd3   :  { %1205 = vmatpush3.msra.mxu0 %v1554_v18 }
  0xd4   :  { %1206 = vmatprep.subr.mxu0 %v1559_v22 }
  0xd5   :  { %1207 = vmatpush3.msra.mxu0 %v1559_v22 }
  0xd6   :  { %1208 = vmatprep.subr.mxu0 %v1564_v24 }
  0xd7   :  { %1209 = vmatpush3.msra.mxu0 %v1564_v24 }
  0xd8   :  { %1210 = vmatprep.subr.mxu0 %v1569_v26 }
  0xd9   :  { %1211 = vmatpush3.msra.mxu0 %v1569_v26 }
  0xda   :  { %1212 = vmatprep.subr.mxu0 %v1574_v28 }
  0xdb   :  { %1213 = vmatpush3.msra.mxu0 %v1574_v28 }
  0xdc   :  { %1214 = vmatprep.subr.mxu0 %v1579_v30 }
  0xdd   :  { %1215 = vmatpush3.msra.mxu0 %v1579_v30 }
  0xde   :  { %1216 = vmatprep.subr.mxu0 %v1584_v34 }
  0xdf   :  { %1217 = vmatpush3.msra.mxu0 %v1584_v34 }
 0x115   :  { %v1156_v14 = vpop.f32.mrf.mxu0 }
 0x117   :  { %v203_v15 = vpop.f32.mrf.mxu0 }
 0x118   :  { %1199 = vmatprep.mubr.msk.f32.mxu1 %vm419_vm1, %v203_v15 }
 0x188   :  { %v1169_v17 = vpop.f32.mrf.mxu1 }
 0x189   :  { %v410_v19 = vmul.f32 %v1169_v17, %v1552_v16  ;;  %v408_v23 = vmul.f32 %v1169_v17, %v1559_v22  ;;  %v406_v27 = vmul.f32 %v1169_v17, %v1569_v26  ;;  %v404_v33 = vmul.f32 %v1169_v17, %v1579_v30 }
 0x18a   :  { %v304_v20 = vpop.f32.mrf.mxu1 }
 0x18b   :  { %v409_v21 = vmul.f32 %v304_v20, %v1554_v18  ;;  %1183 = vmatprep.subr.msk.mxu1 %vm419_vm1, %v410_v19  ;;  %v407_v25 = vmul.f32 %v304_v20, %v1564_v24  ;;  %v405_v29 = vmul.f32 %v304_v20, %v1574_v28  ;;  %v403_v37 = vmul.f32 %v304_v20, %v1584_v34 }
 0x18c   :  { %1184 = vmatpush3.xpose.msk.msra.mxu1 %vm419_vm1, %v410_v19 }
 0x18d   :  { %1185 = vmatprep.subr.msk.mxu1 %vm419_vm1, %v409_v21 }
 0x190   :  { %1186 = vmatpush3.xpose.msk.msra.mxu1 %vm419_vm1, %v409_v21  ;;  %v1182_v49 = vpop.f32.mrf.mxu0 }
 0x191   :  { %1187 = vmatprep.subr.msk.mxu1 %vm419_vm1, %v408_v23  ;;  %v418_v50 = vmul.f32 %v1182_v49, %v1552_v16  ;;  %v416_v61 = vmul.f32 %v1182_v49, %v1559_v22  ;;  %v414_v63 = vmul.f32 %v1182_v49, %v1569_v26  ;;  %v412_v1 = vmul.f32 %v1182_v49, %v1579_v30 }
 0x192   :  { %v394_v57 = vpop.f32.mrf.mxu0 }
 0x193   :  { %1221 = vmatprep.subr.mxu0 %v418_v50  ;;  %v417_v60 = vmul.f32 %v394_v57, %v1554_v18  ;;  %v415_v62 = vmul.f32 %v394_v57, %v1564_v24  ;;  %v413_v0 = vmul.f32 %v394_v57, %v1574_v28  ;;  %v411_v2 = vmul.f32 %v394_v57, %v1584_v34 }
 0x194   :  { %1188 = vmatpush3.xpose.msk.msra.mxu1 %vm419_vm1, %v408_v23 }
 0x195   :  { %1189 = vmatprep.subr.msk.mxu1 %vm419_vm1, %v407_v25 }
 0x198   :  { %1190 = vmatpush3.xpose.msk.msra.mxu1 %vm419_vm1, %v407_v25 }
 0x199   :  { %1191 = vmatprep.subr.msk.mxu1 %vm419_vm1, %v406_v27 }
 0x19c   :  { %1192 = vmatpush3.xpose.msk.msra.mxu1 %vm419_vm1, %v406_v27  ;;  %v702_v27 = vlaneseq }
 0x19d   :  { %1193 = vmatprep.subr.msk.mxu1 %vm419_vm1, %v405_v29 }
 0x1a0   :  { %1194 = vmatpush3.xpose.msk.msra.mxu1 %vm419_vm1, %v405_v29 }
 0x1a1   :  { %1195 = vmatprep.subr.msk.mxu1 %vm419_vm1, %v404_v33 }
 0x1a4   :  { %1196 = vmatpush3.xpose.msk.msra.mxu1 %vm419_vm1, %v404_v33 }
 0x1a5   :  { %1197 = vmatprep.subr.msk.mxu1 %vm419_vm1, %v403_v37 }
 0x1a8   :  { %1198 = vmatpush3.xpose.msk.msra.mxu1 %vm419_vm1, %v403_v37 }
 0x1a9   :  { %1240 = vmatprep.subr.mxu1 %v118_v3 }
 0x1ab   :  { %1200 = vmatmul.mubr.msk.f32.vlgmr.msra.gmra.mxu1 %vm419_vm1, %v1156_v14 }
 0x1ac   :  { %1241 = vmatpush3.msra.mxu1 %v118_v3 }
 0x1ad   :  { %1242 = vmatprep.subr.mxu1 %v117_v4 }
 0x1ae   :  { %1243 = vmatpush3.msra.mxu1 %v117_v4 }
 0x1af   :  { %1244 = vmatprep.subr.mxu1 %v116_v6 }
 0x1b0   :  { %1245 = vmatpush3.msra.mxu1 %v116_v6 }
 0x1b1   :  { %1246 = vmatprep.subr.mxu1 %v115_v8 }
 0x1b2   :  { %1247 = vmatpush3.msra.mxu1 %v115_v8 }
 0x26b   :  { %v1201_v39 = vpop.f32.mrf.mxu1 }
 0x26c   :  { %v526_v41 = vmul.f32 0.35355338, %v1201_v39 }
 0x26d   :  { %v516_v42 = vpop.f32.mrf.mxu1 }
 0x26e   :  { %v525_v44 = vmul.f32 0.35355338, %v516_v42  ;;  %v528_v45 = vadd.f32 %v526_v41, %v128_v40 }
 0x270   :  { %v533_v46 = vsel %vm529_vm2, %v528_v45, -inf  ;;  %v527_v47 = vadd.f32 %v525_v44, %v127_v43 }
 0x271   :  { %534 = vmax.xlane.f32.xlu1 %v533_v46 }
 0x272   :  { %v530_v48 = vsel %vm529_vm2, %v527_v47, -inf }
 0x273   :  { %531 = vmax.xlane.f32.xlu0 %v530_v48 }
 0x282   :  { %807 = vrot.lane.b32.xlu1 %v117_v4, %s1458_s4 }
 0x286   :  { %803 = vrot.lane.b32.xlu1 %v115_v8, %s1458_s4 }
 0x289   :  { %809 = vrot.lane.b32.xlu0 %v118_v3, %s1458_s4 }
 0x28a   :  { %922 = vrot.lane.b32.xlu1 %v1554_v18, %s1458_s4 }
 0x28d   :  { %805 = vrot.lane.b32.xlu0 %v116_v6, %s1458_s4 }
 0x28e   :  { %918 = vrot.lane.b32.xlu1 %v1564_v24, %s1458_s4 }
 0x291   :  { %924 = vrot.lane.b32.xlu0 %v1552_v16, %s1458_s4 }
 0x292   :  { %914 = vrot.lane.b32.xlu1 %v1574_v28, %s1458_s4  ;;  %v703_v28 = vshrl.u32 %v702_v27, 7 }
 0x294   :  { %v704_v29 = vsub.s32 0, %v703_v28  ;;  %v789_v31 = vsub.s32 3, %v703_v28  ;;  %v797_v44 = vsub.s32 1, %v703_v28 }
 0x295   :  { %920 = vrot.lane.b32.xlu0 %v1559_v22, %s1458_s4 }
 0x296   :  { %910 = vrot.lane.b32.xlu1 %v1584_v34, %s1458_s4 }
 0x299   :  { %916 = vrot.lane.b32.xlu0 %v1569_v26, %s1458_s4 }
 0x29d   :  { %912 = vrot.lane.b32.xlu0 %v1579_v30, %s1458_s4  ;;  %v129_v30 = vld [vmem:[#allocation11 + $0x10] sm:$0xff] }
 0x29e   :  { %v705_v32 = vrot.slane %v129_v30, %v704_v29  ;;  %v790_v34 = vrot.slane %v129_v30, %v789_v31 }
 0x2fa   :  { %v535_v51 = vpop.xlane.xlu1 %534 }
 0x2fb   :  { %v537_v52 = vsub.f32 %v528_v45, %v535_v51  ;;  %v798_v45 = vrot.slane %v129_v30, %v797_v44  ;;  %v1017_v51 = vsub.s32 4, %v703_v28 }
 0x2fc   :  { %v532_v53 = vpop.xlane.xlu0 %531 }
 0x2fd   :  { %v536_v54 = vsub.f32 %v527_v47, %v532_v53  ;;  %v540_v55 = vmul.f32 1.442695, %v537_v52  ;;  %v1018_v53 = vrot.slane %v129_v30, %v1017_v51 }
 0x2fe   :  { %v808_v18 = vpop.permute.xlu1 %807 }
 0x2ff   :  { %v538_v56 = vmul.f32 1.442695, %v536_v54 }
 0x300   :  { %v810_v9 = vpop.permute.xlu0 %809 }
 0x301   :  { %1292 = vpow2.f32 %v538_v56  ;;  %1251 = vmatprep.subr.mxu1 %v810_v9 }
 0x302   :  { %1294 = vpow2.f32 %v540_v55  ;;  %v804_v20 = vpop.permute.xlu1 %803 }
 0x304   :  { %v806_v19 = vpop.permute.xlu0 %805 }
 0x306   :  { %v923_v22 = vpop.permute.xlu1 %922 }
 0x308   :  { %v925_v21 = vpop.permute.xlu0 %924 }
 0x30a   :  { %v919_v24 = vpop.permute.xlu1 %918 }
 0x30c   :  { %v921_v23 = vpop.permute.xlu0 %920 }
 0x30e   :  { %v1293_v58 = vpop.eup %1292  ;;  %v915_v26 = vpop.permute.xlu1 %914 }
 0x30f   :  { %v1295_v59 = vpop.eup %1294  ;;  %1218 = vmatprep.mubr.msk.f32.mxu0 %vm529_vm2, %v1293_v58 }
 0x310   :  { %1219 = vmatmul.mubr.msk.f32.vlgmr.msra.gmra.mxu0 %vm529_vm2, %v1295_v59  ;;  %v917_v25 = vpop.permute.xlu0 %916 }
 0x311   :  { %1222 = vmatpush3.msra.mxu0 %v418_v50  ;;  %1237 = vmatprep.mubr.msk.f32.mxu0 %vm529_vm2, %v1293_v58 }
 0x312   :  { %1223 = vmatprep.subr.mxu0 %v417_v60  ;;  %v911_v43 = vpop.permute.xlu1 %910 }
 0x313   :  { %1224 = vmatpush3.msra.mxu0 %v417_v60 }
 0x314   :  { %1225 = vmatprep.subr.mxu0 %v416_v61  ;;  %v913_v42 = vpop.permute.xlu0 %912 }
 0x315   :  { %1226 = vmatpush3.msra.mxu0 %v416_v61 }
 0x316   :  { %1227 = vmatprep.subr.mxu0 %v415_v62 }
 0x317   :  { %1228 = vmatpush3.msra.mxu0 %v415_v62 }
 0x318   :  { %1229 = vmatprep.subr.mxu0 %v414_v63 }
 0x319   :  { %1230 = vmatpush3.msra.mxu0 %v414_v63 }
 0x31a   :  { %1231 = vmatprep.subr.mxu0 %v413_v0 }
 0x31b   :  { %1232 = vmatpush3.msra.mxu0 %v413_v0 }
 0x31c   :  { %1233 = vmatprep.subr.mxu0 %v412_v1 }
 0x31d   :  { %1234 = vmatpush3.msra.mxu0 %v412_v1 }
 0x31e   :  { %1235 = vmatprep.subr.mxu0 %v411_v2 }
 0x31f   :  { %1236 = vmatpush3.msra.mxu0 %v411_v2 }
 0x320   :  { %1238 = vmatmul.mubr.msk.f32.vlgmr.msra.gmra.mxu0 %vm529_vm2, %v1295_v59  ;;  %1262 = vmatprep.subr.mxu0 %v925_v21 }
 0x321   :  { %1263 = vmatpush3.msra.mxu0 %v925_v21 }
 0x322   :  { %1264 = vmatprep.subr.mxu0 %v923_v22 }
 0x323   :  { %1265 = vmatpush3.msra.mxu0 %v923_v22 }
 0x324   :  { %1266 = vmatprep.subr.mxu0 %v921_v23 }
 0x325   :  { %1267 = vmatpush3.msra.mxu0 %v921_v23 }
 0x326   :  { %1268 = vmatprep.subr.mxu0 %v919_v24 }
 0x327   :  { %1269 = vmatpush3.msra.mxu0 %v919_v24 }
 0x328   :  { %1270 = vmatprep.subr.mxu0 %v917_v25 }
 0x329   :  { %1271 = vmatpush3.msra.mxu0 %v917_v25 }
 0x32a   :  { %1272 = vmatprep.subr.mxu0 %v915_v26 }
 0x32b   :  { %1273 = vmatpush3.msra.mxu0 %v915_v26 }
 0x32c   :  { %1274 = vmatprep.subr.mxu0 %v913_v42 }
 0x32d   :  { %1275 = vmatpush3.msra.mxu0 %v913_v42 }
 0x32e   :  { %1276 = vmatprep.subr.mxu0 %v911_v43 }
 0x32f   :  { %1277 = vmatpush3.msra.mxu0 %v911_v43 }
 0x3d0   :  { %v1220_v10 = vpop.f32.mrf.mxu0 }
 0x3d2   :  { %v614_v11 = vpop.f32.mrf.mxu0 }
 0x3d3   :  { %1296 = vrcp.f32 %v614_v11 }
 0x3d4   :  { %1298 = vrcp.f32 %v1220_v10 }
 0x3e0   :  { %v1297_v12 = vpop.eup %1296  ;;  %v1239_v13 = vpop.f32.mrf.mxu0 }
 0x3e1   :  { %v1299_v14 = vpop.eup %1298 }
 0x3e2   :  { %v689_v15 = vpop.f32.mrf.mxu0  ;;  %v701_v17 = vmul.f32 %v1299_v14, %v1239_v13 }
 0x3e3   :  { %v700_v16 = vmul.f32 %v1297_v12, %v689_v15 }
 0x3e5   :  { %1248 = vmatprep.mubr.msk.f32.mxu1 %vm419_vm1, %v700_v16 }
 0x3e6   :  { %1249 = vmatmul.mubr.msk.f32.vlgmr.msra.gmra.mxu1 %vm419_vm1, %v701_v17 }
 0x3e7   :  { %1252 = vmatpush3.msra.mxu1 %v810_v9 }
 0x3e8   :  { %1253 = vmatprep.subr.mxu1 %v808_v18 }
 0x3e9   :  { %1254 = vmatpush3.msra.mxu1 %v808_v18 }
 0x3ea   :  { %1255 = vmatprep.subr.mxu1 %v806_v19 }
 0x3eb   :  { %1256 = vmatpush3.msra.mxu1 %v806_v19 }
 0x3ec   :  { %1257 = vmatprep.subr.mxu1 %v804_v20 }
 0x3ed   :  { %1258 = vmatpush3.msra.mxu1 %v804_v20 }
 0x4a6   :  { %v1250_v33 = vpop.f32.mrf.mxu1 }
 0x4a7   :  { %v784_v35 = vadd.f32 %v1250_v33, %v705_v32 }
 0x4a8   :  { %v778_v36 = vpop.f32.mrf.mxu1 }
 0x4a9   :  { %v779_v37 = vadd.f32 %v778_v36, %v705_v32  ;;  %v792_v38 = vmul.f32 %v790_v34, %v784_v35 }
 0x4ab   :  { %v791_v39 = vmul.f32 %v790_v34, %v779_v37  ;;  %v794_v41 = vadd.f32 %v792_v38, %v1542_v7  ;;  %v900_v7 = vsub.s32 2, %v703_v28 }
 0x4ad   :  { %v793_v40 = vadd.f32 %v791_v39, %v1535_v5  ;;  %v901_v52 = vrot.slane %v129_v30, %v900_v7 }
 0x4af   :  { %1259 = vmatprep.mubr.msk.f32.mxu1 %vm419_vm1, %v793_v40 }
 0x4b0   :  { %1260 = vmatmul.mubr.msk.f32.vlgmr.msra.gmra.mxu1 %vm419_vm1, %v794_v41 }
 0x570   :  { %v1261_v46 = vpop.f32.mrf.mxu1 }
 0x571   :  { %v893_v47 = vadd.f32 %v1261_v46, %v798_v45 }
 0x572   :  { %v887_v48 = vpop.f32.mrf.mxu1 }
 0x573   :  { %v888_v49 = vadd.f32 %v887_v48, %v798_v45  ;;  %v897_v5 = vmax.f32 %v893_v47, 0.0 }
 0x575   :  { %v896_v50 = vmax.f32 %v888_v49, 0.0 }
 0x577   :  { %1278 = vmatprep.mubr.msk.f32.mxu0 %vm529_vm2, %v896_v50 }
 0x578   :  { %1279 = vmatmul.mubr.msk.f32.vlgmr.msra.gmra.mxu0 %vm529_vm2, %v897_v5 }
 0x638   :  { %v1280_v54 = vpop.f32.mrf.mxu0 }
 0x639   :  { %v1012_v55 = vadd.f32 %v1280_v54, %v901_v52 }
 0x63a   :  { %v1006_v56 = vpop.f32.mrf.mxu0 }
 0x63b   :  { %v1020_v57 = vmul.f32 %v1018_v53, %v1012_v55  ;;  %v1007_v58 = vadd.f32 %v1006_v56, %v901_v52 }
 0x63d   :  { %v1022_v59 = vadd.f32 %v1020_v57, %v794_v41  ;;  %v1019_v60 = vmul.f32 %v1018_v53, %v1007_v58 }
 0x63f   :  { %1024 = vst.msk [vmem:[#allocation13 + $0x8] sm:$0xff] %vm419_vm1, %v1022_v59  ;;  %v1021_v61 = vadd.f32 %v1019_v60, %v793_v40 }
 0x641   :  { %1023 = vst.msk [vmem:[#allocation13] sm:$0xff] %vm419_vm1, %v1021_v61 }
 0x642   :  { %1431 = shalt.err (!%p1428_p6)
}
 0x643   :  { %1036 = dma.vmem_to_hbm [thread:$0]  %s1031_s28, 256, %s1667_s6, [#allocation4], %s1452_s26, %s1452_s26, %s1453_s27  }
 0x644   :  { %1448 = dma.done.wait [#allocation4], 256  }
 0x645   :  { %1449 = vsyncadd [#allocation4], 4294967040 }
 0x646   :  { %1040 = vsyncpa [#allocation3], 1 }
 0x647   :  { %1041 = vsyncpa [#allocation6], 1 }
 0x648   :  { %1042 = vsyncpa [#allocation9], 1 }
 0x649   :  { %1043 = vsyncpa [#allocation12], 1 }
 0x64a   :  { %1044 = vsyncpa [#allocation4], 1 }

</bundles_post_ra>
